<compile_context>
chip_gen: v5e
topology: v5e:2x2
jax: 0.10.0
libtpu: 0.0.40
codegen_flags: <defaults>
</compile_context>

<pallas_src>
import jax
import jax.numpy as jnp
from jax.experimental import pallas as pl
from jax.experimental.pallas import tpu as pltpu


def _largest_divisor_leq(n, cap):
    for d in range(min(n, cap), 0, -1):
        if n % d == 0:
            return d
    return 1


# ----------------------------------------------------------------------------
# Embedding gather kernel (scalar-prefetched ids drive per-row HBM DMAs)
# ----------------------------------------------------------------------------
def _gather_kernel(ids_ref, table_hbm, out_ref, row_buf, sem):
    b = pl.program_id(0)
    t = pl.program_id(1)
    tblk, _ = row_buf.shape
    V = table_hbm.shape[0]
    base = t * tblk

    # Issue all row DMAs (HBM -> VMEM scratch), then wait for all of them.
    for r in range(tblk):
        tok = jnp.clip(ids_ref[b, base + r], 0, V - 1)
        pltpu.make_async_copy(
            table_hbm.at[pl.ds(tok, 1), :],
            row_buf.at[pl.ds(r, 1), :],
            sem.at[0],
        ).start()
    for r in range(tblk):
        pltpu.make_async_copy(
            table_hbm.at[pl.ds(0, 1), :],
            row_buf.at[pl.ds(r, 1), :],
            sem.at[0],
        ).wait()

    out_ref[0, :, :] = row_buf[...]


def _embedding_gather(embed_table, input_ids, *, tblk):
    B, S = input_ids.shape
    V, H = embed_table.shape
    itemsize = jnp.dtype(embed_table.dtype).itemsize

    # scratch row buffer + 2x double-buffered output block + margin
    vmem_bytes = int(min(3 * tblk * H * itemsize + (2 << 20), 64 << 20))

    grid_spec = pltpu.PrefetchScalarGridSpec(
        num_scalar_prefetch=1,                       # input_ids -> SMEM
        grid=(B, S // tblk),
        in_specs=[pl.BlockSpec(memory_space=pl.ANY)],  # table stays in HBM
        out_specs=pl.BlockSpec((1, tblk, H), lambda b, t, ids: (b, t, 0)),
        scratch_shapes=[
            pltpu.VMEM((tblk, H), embed_table.dtype),
            pltpu.SemaphoreType.DMA((1,)),
        ],
    )
    return pl.pallas_call(
        _gather_kernel,
        grid_spec=grid_spec,
        out_shape=jax.ShapeDtypeStruct((B, S, H), embed_table.dtype),
        compiler_params=pltpu.CompilerParams(
            dimension_semantics=("parallel", "parallel"),
            vmem_limit_bytes=vmem_bytes,
        ),
    )(input_ids, embed_table)


# ----------------------------------------------------------------------------
# Causal + padding additive mask kernel (tiled over query blocks)
# ----------------------------------------------------------------------------
def _mask_kernel(am_ref, mask_ref):
    q = pl.program_id(1)
    tq = mask_ref.shape[2]
    S = mask_ref.shape[3]

    i_idx = jax.lax.broadcasted_iota(jnp.int32, (tq, S), 0) + q * tq  # query
    j_idx = jax.lax.broadcasted_iota(jnp.int32, (tq, S), 1)           # key
    causal_ok = j_idx <= i_idx
    pad_ok = am_ref[...] != 0                                         # (1, S)
    allowed = jnp.logical_and(causal_ok, pad_ok)                      # (tq, S)
    neg = jnp.finfo(mask_ref.dtype).min
    mask_ref[0, 0, :, :] = jnp.where(allowed, 0.0, neg).astype(mask_ref.dtype)


def _causal_pad_mask(attention_mask, mask_dtype, *, tq):
    B, S = attention_mask.shape
    itemsize = jnp.dtype(mask_dtype).itemsize
    vmem_bytes = int(min(2 * (tq * S * itemsize + S * 4) + (2 << 20), 64 << 20))

    return pl.pallas_call(
        _mask_kernel,
        out_shape=jax.ShapeDtypeStruct((B, 1, S, S), mask_dtype),
        grid=(B, S // tq),
        in_specs=[pl.BlockSpec((1, S), lambda b, q: (b, 0))],
        out_specs=pl.BlockSpec((1, 1, tq, S), lambda b, q: (b, 0, q, 0)),
        compiler_params=pltpu.CompilerParams(
            dimension_semantics=("parallel", "parallel"),
            vmem_limit_bytes=vmem_bytes,
        ),
    )(attention_mask)


# ----------------------------------------------------------------------------
# Module forward
# ----------------------------------------------------------------------------
def embedding_pipe_forward(embed_table, inputs, attn_implementation="eager"):
    """JAX/Pallas equivalent of EmbeddingPipe.forward."""
    input_ids, attention_mask, position_ids, labels = inputs
    B, S = input_ids.shape

    tblk = _largest_divisor_leq(S, 64)    # embedding rows gathered per step
    hidden_states = _embedding_gather(
        embed_table, input_ids.astype(jnp.int32), tblk=tblk)

    if attn_implementation == "flash_attention_2":
        assert attention_mask is not None and attention_mask.ndim == 2
        out_mask = attention_mask
    else:
        if attention_mask is None:
            attention_mask = jnp.ones((B, S), dtype=jnp.int32)
        tq = _largest_divisor_leq(S, 256)  # query-tile of the (S, S) mask
        out_mask = _causal_pad_mask(
            attention_mask.astype(jnp.int32), embed_table.dtype, tq=tq)

    # TODO(synk): requires_grad_() / embedding_on_cpu have no JAX equivalent
    # (autodiff is jax.grad; device placement is jax.device_put).
    return hidden_states, out_mask, position_ids, labels


if __name__ == "__main__":
    B, S, H, V = 2, 8, 128, 256

    key = jax.random.PRNGKey(0)
    k_emb, k_ids = jax.random.split(key)

    # Deterministic synthetic embedding weight (the module's nn.Embedding).
    embed_table = jax.random.normal(k_emb, (V, H), dtype=jnp.float32) * 0.02

    input_ids = jax.random.randint(k_ids, (B, S), 0, V, dtype=jnp.int32)
    # Padding on the tail of batch element 1.
    attention_mask = jnp.ones((B, S), dtype=jnp.int32).at[1, S - 2:].set(0)
    position_ids = jnp.broadcast_to(jnp.arange(S, dtype=jnp.int32)[None, :], (B, S))
    labels = input_ids

    hs, mask4d, pos, lab = embedding_pipe_forward(
        embed_table, (input_ids, attention_mask, position_ids, labels),
        attn_implementation="eager",
    )
    jax.block_until_ready((hs, mask4d, pos, lab))

    # Pure-JAX reference check.
    ref_hs = jnp.take(embed_table, input_ids, axis=0)
    i = jnp.arange(S)[:, None]
    j = jnp.arange(S)[None, :]
    causal = (j <= i)[None, None, :, :]
    pad = (attention_mask != 0)[:, None, None, :]
    ref_mask = jnp.where(causal & pad, 0.0, jnp.finfo(jnp.float32).min)

    assert hs.shape == (B, S, H) and mask4d.shape == (B, 1, S, S)
    assert jnp.allclose(hs, ref_hs, atol=1e-6, rtol=1e-6)
    assert jnp.allclose(mask4d, ref_mask)

    print("KERNEL_OK")
</pallas_src>

<mosaic_0001>
module attributes {stable_mosaic.version = 11 : i64} {
  func.func @_gather_kernel(%arg0: i32, %arg1: i32, %arg2: memref<2x8xi32, #tpu.memory_space<smem>>, %arg3: memref<256x128xf32, #tpu.memory_space<any>>, %arg4: memref<1x8x128xf32, #tpu.memory_space<vmem>>, %arg5: memref<8x128xf32, #tpu.memory_space<vmem>>, %arg6: memref<1x!tpu.dma_semaphore, #tpu.memory_space<semaphore_mem>>) attributes {dimension_semantics = [#tpu.dimension_semantics<parallel>, #tpu.dimension_semantics<parallel>], iteration_bounds = array<i64: 2, 1>, scalar_prefetch = 1 : i64, scratch_operands = 2 : i64, tpu.core_type = #tpu.core_type<tc>, window_params = [{}, {transform_indices = @transform_1, window_bounds = array<i64: 1, 8, 128>}]} {
    %c8_i32 = arith.constant 8 : i32
    %0 = arith.muli %arg1, %c8_i32 : i32
    %c0_i32 = arith.constant 0 : i32
    %1 = arith.addi %0, %c0_i32 : i32
    %2 = arith.index_cast %arg0 : i32 to index
    %3 = arith.index_cast %1 : i32 to index
    %4 = memref.load %arg2[%2, %3] : memref<2x8xi32, #tpu.memory_space<smem>>
    %c0_i32_0 = arith.constant 0 : i32
    %c255_i32 = arith.constant 255 : i32
    %5 = arith.maxsi %c0_i32_0, %4 : i32
    %6 = arith.minsi %c255_i32, %5 : i32
    %c0_i32_1 = arith.constant 0 : i32
    %c0_i32_2 = arith.constant 0 : i32
    %7 = tpu.memref_slice %arg3[%6, %c0_i32_2] : memref<256x128xf32, #tpu.memory_space<any>> -> memref<1x128xf32, #tpu.memory_space<any>>
    %c0_i32_3 = arith.constant 0 : i32
    %c0_i32_4 = arith.constant 0 : i32
    %8 = tpu.memref_slice %arg5[%c0_i32_3, %c0_i32_4] : memref<8x128xf32, #tpu.memory_space<vmem>> -> memref<1x128xf32, #tpu.memory_space<vmem>>
    %9 = tpu.memref_slice %arg6[%c0_i32_1] : memref<1x!tpu.dma_semaphore, #tpu.memory_space<semaphore_mem>> -> memref<1x!tpu.dma_semaphore, #tpu.memory_space<semaphore_mem>>
    %10 = tpu.memref_squeeze %9 : memref<1x!tpu.dma_semaphore, #tpu.memory_space<semaphore_mem>> -> memref<!tpu.dma_semaphore, #tpu.memory_space<semaphore_mem>>
    tpu.enqueue_dma source(%7 : memref<1x128xf32, #tpu.memory_space<any>>) target(%8 : memref<1x128xf32, #tpu.memory_space<vmem>>) target_semaphore(%10 : memref<!tpu.dma_semaphore, #tpu.memory_space<semaphore_mem>>)
    %c1_i32 = arith.constant 1 : i32
    %11 = arith.addi %0, %c1_i32 : i32
    %12 = arith.index_cast %arg0 : i32 to index
    %13 = arith.index_cast %11 : i32 to index
    %14 = memref.load %arg2[%12, %13] : memref<2x8xi32, #tpu.memory_space<smem>>
    %c0_i32_5 = arith.constant 0 : i32
    %c255_i32_6 = arith.constant 255 : i32
    %15 = arith.maxsi %c0_i32_5, %14 : i32
    %16 = arith.minsi %c255_i32_6, %15 : i32
    %c0_i32_7 = arith.constant 0 : i32
    %c0_i32_8 = arith.constant 0 : i32
    %17 = tpu.memref_slice %arg3[%16, %c0_i32_8] : memref<256x128xf32, #tpu.memory_space<any>> -> memref<1x128xf32, #tpu.memory_space<any>>
    %c1_i32_9 = arith.constant 1 : i32
    %c0_i32_10 = arith.constant 0 : i32
    %18 = tpu.memref_slice %arg5[%c1_i32_9, %c0_i32_10] : memref<8x128xf32, #tpu.memory_space<vmem>> -> memref<1x128xf32, #tpu.memory_space<vmem>>
    %19 = tpu.memref_slice %arg6[%c0_i32_7] : memref<1x!tpu.dma_semaphore, #tpu.memory_space<semaphore_mem>> -> memref<1x!tpu.dma_semaphore, #tpu.memory_space<semaphore_mem>>
    %20 = tpu.memref_squeeze %19 : memref<1x!tpu.dma_semaphore, #tpu.memory_space<semaphore_mem>> -> memref<!tpu.dma_semaphore, #tpu.memory_space<semaphore_mem>>
    tpu.enqueue_dma source(%17 : memref<1x128xf32, #tpu.memory_space<any>>) target(%18 : memref<1x128xf32, #tpu.memory_space<vmem>>) target_semaphore(%20 : memref<!tpu.dma_semaphore, #tpu.memory_space<semaphore_mem>>)
    %c2_i32 = arith.constant 2 : i32
    %21 = arith.addi %0, %c2_i32 : i32
    %22 = arith.index_cast %arg0 : i32 to index
    %23 = arith.index_cast %21 : i32 to index
    %24 = memref.load %arg2[%22, %23] : memref<2x8xi32, #tpu.memory_space<smem>>
    %c0_i32_11 = arith.constant 0 : i32
    %c255_i32_12 = arith.constant 255 : i32
    %25 = arith.maxsi %c0_i32_11, %24 : i32
    %26 = arith.minsi %c255_i32_12, %25 : i32
    %c0_i32_13 = arith.constant 0 : i32
    %c0_i32_14 = arith.constant 0 : i32
    %27 = tpu.memref_slice %arg3[%26, %c0_i32_14] : memref<256x128xf32, #tpu.memory_space<any>> -> memref<1x128xf32, #tpu.memory_space<any>>
    %c2_i32_15 = arith.constant 2 : i32
    %c0_i32_16 = arith.constant 0 : i32
    %28 = tpu.memref_slice %arg5[%c2_i32_15, %c0_i32_16] : memref<8x128xf32, #tpu.memory_space<vmem>> -> memref<1x128xf32, #tpu.memory_space<vmem>>
    %29 = tpu.memref_slice %arg6[%c0_i32_13] : memref<1x!tpu.dma_semaphore, #tpu.memory_space<semaphore_mem>> -> memref<1x!tpu.dma_semaphore, #tpu.memory_space<semaphore_mem>>
    %30 = tpu.memref_squeeze %29 : memref<1x!tpu.dma_semaphore, #tpu.memory_space<semaphore_mem>> -> memref<!tpu.dma_semaphore, #tpu.memory_space<semaphore_mem>>
    tpu.enqueue_dma source(%27 : memref<1x128xf32, #tpu.memory_space<any>>) target(%28 : memref<1x128xf32, #tpu.memory_space<vmem>>) target_semaphore(%30 : memref<!tpu.dma_semaphore, #tpu.memory_space<semaphore_mem>>)
    %c3_i32 = arith.constant 3 : i32
    %31 = arith.addi %0, %c3_i32 : i32
    %32 = arith.index_cast %arg0 : i32 to index
    %33 = arith.index_cast %31 : i32 to index
    %34 = memref.load %arg2[%32, %33] : memref<2x8xi32, #tpu.memory_space<smem>>
    %c0_i32_17 = arith.constant 0 : i32
    %c255_i32_18 = arith.constant 255 : i32
    %35 = arith.maxsi %c0_i32_17, %34 : i32
    %36 = arith.minsi %c255_i32_18, %35 : i32
    %c0_i32_19 = arith.constant 0 : i32
    %c0_i32_20 = arith.constant 0 : i32
    %37 = tpu.memref_slice %arg3[%36, %c0_i32_20] : memref<256x128xf32, #tpu.memory_space<any>> -> memref<1x128xf32, #tpu.memory_space<any>>
    %c3_i32_21 = arith.constant 3 : i32
    %c0_i32_22 = arith.constant 0 : i32
    %38 = tpu.memref_slice %arg5[%c3_i32_21, %c0_i32_22] : memref<8x128xf32, #tpu.memory_space<vmem>> -> memref<1x128xf32, #tpu.memory_space<vmem>>
    %39 = tpu.memref_slice %arg6[%c0_i32_19] : memref<1x!tpu.dma_semaphore, #tpu.memory_space<semaphore_mem>> -> memref<1x!tpu.dma_semaphore, #tpu.memory_space<semaphore_mem>>
    %40 = tpu.memref_squeeze %39 : memref<1x!tpu.dma_semaphore, #tpu.memory_space<semaphore_mem>> -> memref<!tpu.dma_semaphore, #tpu.memory_space<semaphore_mem>>
    tpu.enqueue_dma source(%37 : memref<1x128xf32, #tpu.memory_space<any>>) target(%38 : memref<1x128xf32, #tpu.memory_space<vmem>>) target_semaphore(%40 : memref<!tpu.dma_semaphore, #tpu.memory_space<semaphore_mem>>)
    %c4_i32 = arith.constant 4 : i32
    %41 = arith.addi %0, %c4_i32 : i32
    %42 = arith.index_cast %arg0 : i32 to index
    %43 = arith.index_cast %41 : i32 to index
    %44 = memref.load %arg2[%42, %43] : memref<2x8xi32, #tpu.memory_space<smem>>
    %c0_i32_23 = arith.constant 0 : i32
    %c255_i32_24 = arith.constant 255 : i32
    %45 = arith.maxsi %c0_i32_23, %44 : i32
    %46 = arith.minsi %c255_i32_24, %45 : i32
    %c0_i32_25 = arith.constant 0 : i32
    %c0_i32_26 = arith.constant 0 : i32
    %47 = tpu.memref_slice %arg3[%46, %c0_i32_26] : memref<256x128xf32, #tpu.memory_space<any>> -> memref<1x128xf32, #tpu.memory_space<any>>
    %c4_i32_27 = arith.constant 4 : i32
    %c0_i32_28 = arith.constant 0 : i32
    %48 = tpu.memref_slice %arg5[%c4_i32_27, %c0_i32_28] : memref<8x128xf32, #tpu.memory_space<vmem>> -> memref<1x128xf32, #tpu.memory_space<vmem>>
    %49 = tpu.memref_slice %arg6[%c0_i32_25] : memref<1x!tpu.dma_semaphore, #tpu.memory_space<semaphore_mem>> -> memref<1x!tpu.dma_semaphore, #tpu.memory_space<semaphore_mem>>
    %50 = tpu.memref_squeeze %49 : memref<1x!tpu.dma_semaphore, #tpu.memory_space<semaphore_mem>> -> memref<!tpu.dma_semaphore, #tpu.memory_space<semaphore_mem>>
    tpu.enqueue_dma source(%47 : memref<1x128xf32, #tpu.memory_space<any>>) target(%48 : memref<1x128xf32, #tpu.memory_space<vmem>>) target_semaphore(%50 : memref<!tpu.dma_semaphore, #tpu.memory_space<semaphore_mem>>)
    %c5_i32 = arith.constant 5 : i32
    %51 = arith.addi %0, %c5_i32 : i32
    %52 = arith.index_cast %arg0 : i32 to index
    %53 = arith.index_cast %51 : i32 to index
    %54 = memref.load %arg2[%52, %53] : memref<2x8xi32, #tpu.memory_space<smem>>
    %c0_i32_29 = arith.constant 0 : i32
    %c255_i32_30 = arith.constant 255 : i32
    %55 = arith.maxsi %c0_i32_29, %54 : i32
    %56 = arith.minsi %c255_i32_30, %55 : i32
    %c0_i32_31 = arith.constant 0 : i32
    %c0_i32_32 = arith.constant 0 : i32
    %57 = tpu.memref_slice %arg3[%56, %c0_i32_32] : memref<256x128xf32, #tpu.memory_space<any>> -> memref<1x128xf32, #tpu.memory_space<any>>
    %c5_i32_33 = arith.constant 5 : i32
    %c0_i32_34 = arith.constant 0 : i32
    %58 = tpu.memref_slice %arg5[%c5_i32_33, %c0_i32_34] : memref<8x128xf32, #tpu.memory_space<vmem>> -> memref<1x128xf32, #tpu.memory_space<vmem>>
    %59 = tpu.memref_slice %arg6[%c0_i32_31] : memref<1x!tpu.dma_semaphore, #tpu.memory_space<semaphore_mem>> -> memref<1x!tpu.dma_semaphore, #tpu.memory_space<semaphore_mem>>
    %60 = tpu.memref_squeeze %59 : memref<1x!tpu.dma_semaphore, #tpu.memory_space<semaphore_mem>> -> memref<!tpu.dma_semaphore, #tpu.memory_space<semaphore_mem>>
    tpu.enqueue_dma source(%57 : memref<1x128xf32, #tpu.memory_space<any>>) target(%58 : memref<1x128xf32, #tpu.memory_space<vmem>>) target_semaphore(%60 : memref<!tpu.dma_semaphore, #tpu.memory_space<semaphore_mem>>)
    %c6_i32 = arith.constant 6 : i32
    %61 = arith.addi %0, %c6_i32 : i32
    %62 = arith.index_cast %arg0 : i32 to index
    %63 = arith.index_cast %61 : i32 to index
    %64 = memref.load %arg2[%62, %63] : memref<2x8xi32, #tpu.memory_space<smem>>
    %c0_i32_35 = arith.constant 0 : i32
    %c255_i32_36 = arith.constant 255 : i32
    %65 = arith.maxsi %c0_i32_35, %64 : i32
    %66 = arith.minsi %c255_i32_36, %65 : i32
    %c0_i32_37 = arith.constant 0 : i32
    %c0_i32_38 = arith.constant 0 : i32
    %67 = tpu.memref_slice %arg3[%66, %c0_i32_38] : memref<256x128xf32, #tpu.memory_space<any>> -> memref<1x128xf32, #tpu.memory_space<any>>
    %c6_i32_39 = arith.constant 6 : i32
    %c0_i32_40 = arith.constant 0 : i32
    %68 = tpu.memref_slice %arg5[%c6_i32_39, %c0_i32_40] : memref<8x128xf32, #tpu.memory_space<vmem>> -> memref<1x128xf32, #tpu.memory_space<vmem>>
    %69 = tpu.memref_slice %arg6[%c0_i32_37] : memref<1x!tpu.dma_semaphore, #tpu.memory_space<semaphore_mem>> -> memref<1x!tpu.dma_semaphore, #tpu.memory_space<semaphore_mem>>
    %70 = tpu.memref_squeeze %69 : memref<1x!tpu.dma_semaphore, #tpu.memory_space<semaphore_mem>> -> memref<!tpu.dma_semaphore, #tpu.memory_space<semaphore_mem>>
    tpu.enqueue_dma source(%67 : memref<1x128xf32, #tpu.memory_space<any>>) target(%68 : memref<1x128xf32, #tpu.memory_space<vmem>>) target_semaphore(%70 : memref<!tpu.dma_semaphore, #tpu.memory_space<semaphore_mem>>)
    %c7_i32 = arith.constant 7 : i32
    %71 = arith.addi %0, %c7_i32 : i32
    %72 = arith.index_cast %arg0 : i32 to index
    %73 = arith.index_cast %71 : i32 to index
    %74 = memref.load %arg2[%72, %73] : memref<2x8xi32, #tpu.memory_space<smem>>
    %c0_i32_41 = arith.constant 0 : i32
    %c255_i32_42 = arith.constant 255 : i32
    %75 = arith.maxsi %c0_i32_41, %74 : i32
    %76 = arith.minsi %c255_i32_42, %75 : i32
    %c0_i32_43 = arith.constant 0 : i32
    %c0_i32_44 = arith.constant 0 : i32
    %77 = tpu.memref_slice %arg3[%76, %c0_i32_44] : memref<256x128xf32, #tpu.memory_space<any>> -> memref<1x128xf32, #tpu.memory_space<any>>
    %c7_i32_45 = arith.constant 7 : i32
    %c0_i32_46 = arith.constant 0 : i32
    %78 = tpu.memref_slice %arg5[%c7_i32_45, %c0_i32_46] : memref<8x128xf32, #tpu.memory_space<vmem>> -> memref<1x128xf32, #tpu.memory_space<vmem>>
    %79 = tpu.memref_slice %arg6[%c0_i32_43] : memref<1x!tpu.dma_semaphore, #tpu.memory_space<semaphore_mem>> -> memref<1x!tpu.dma_semaphore, #tpu.memory_space<semaphore_mem>>
    %80 = tpu.memref_squeeze %79 : memref<1x!tpu.dma_semaphore, #tpu.memory_space<semaphore_mem>> -> memref<!tpu.dma_semaphore, #tpu.memory_space<semaphore_mem>>
    tpu.enqueue_dma source(%77 : memref<1x128xf32, #tpu.memory_space<any>>) target(%78 : memref<1x128xf32, #tpu.memory_space<vmem>>) target_semaphore(%80 : memref<!tpu.dma_semaphore, #tpu.memory_space<semaphore_mem>>)
    %c0_i32_47 = arith.constant 0 : i32
    %c0_i32_48 = arith.constant 0 : i32
    %c0_i32_49 = arith.constant 0 : i32
    %81 = tpu.memref_slice %arg3[%c0_i32_48, %c0_i32_49] : memref<256x128xf32, #tpu.memory_space<any>> -> memref<1x128xf32, #tpu.memory_space<any>>
    %c0_i32_50 = arith.constant 0 : i32
    %c0_i32_51 = arith.constant 0 : i32
    %82 = tpu.memref_slice %arg5[%c0_i32_50, %c0_i32_51] : memref<8x128xf32, #tpu.memory_space<vmem>> -> memref<1x128xf32, #tpu.memory_space<vmem>>
    %83 = tpu.memref_slice %arg6[%c0_i32_47] : memref<1x!tpu.dma_semaphore, #tpu.memory_space<semaphore_mem>> -> memref<1x!tpu.dma_semaphore, #tpu.memory_space<semaphore_mem>>
    %84 = tpu.memref_squeeze %83 : memref<1x!tpu.dma_semaphore, #tpu.memory_space<semaphore_mem>> -> memref<!tpu.dma_semaphore, #tpu.memory_space<semaphore_mem>>
    tpu.wait_dma2 semaphore(%84 : memref<!tpu.dma_semaphore, #tpu.memory_space<semaphore_mem>>) src(%81 : memref<1x128xf32, #tpu.memory_space<any>>) dst(%82 : memref<1x128xf32, #tpu.memory_space<vmem>>)
    %c0_i32_52 = arith.constant 0 : i32
    %c0_i32_53 = arith.constant 0 : i32
    %c0_i32_54 = arith.constant 0 : i32
    %85 = tpu.memref_slice %arg3[%c0_i32_53, %c0_i32_54] : memref<256x128xf32, #tpu.memory_space<any>> -> memref<1x128xf32, #tpu.memory_space<any>>
    %c1_i32_55 = arith.constant 1 : i32
    %c0_i32_56 = arith.constant 0 : i32
    %86 = tpu.memref_slice %arg5[%c1_i32_55, %c0_i32_56] : memref<8x128xf32, #tpu.memory_space<vmem>> -> memref<1x128xf32, #tpu.memory_space<vmem>>
    %87 = tpu.memref_slice %arg6[%c0_i32_52] : memref<1x!tpu.dma_semaphore, #tpu.memory_space<semaphore_mem>> -> memref<1x!tpu.dma_semaphore, #tpu.memory_space<semaphore_mem>>
    %88 = tpu.memref_squeeze %87 : memref<1x!tpu.dma_semaphore, #tpu.memory_space<semaphore_mem>> -> memref<!tpu.dma_semaphore, #tpu.memory_space<semaphore_mem>>
    tpu.wait_dma2 semaphore(%88 : memref<!tpu.dma_semaphore, #tpu.memory_space<semaphore_mem>>) src(%85 : memref<1x128xf32, #tpu.memory_space<any>>) dst(%86 : memref<1x128xf32, #tpu.memory_space<vmem>>)
    %c0_i32_57 = arith.constant 0 : i32
    %c0_i32_58 = arith.constant 0 : i32
    %c0_i32_59 = arith.constant 0 : i32
    %89 = tpu.memref_slice %arg3[%c0_i32_58, %c0_i32_59] : memref<256x128xf32, #tpu.memory_space<any>> -> memref<1x128xf32, #tpu.memory_space<any>>
    %c2_i32_60 = arith.constant 2 : i32
    %c0_i32_61 = arith.constant 0 : i32
    %90 = tpu.memref_slice %arg5[%c2_i32_60, %c0_i32_61] : memref<8x128xf32, #tpu.memory_space<vmem>> -> memref<1x128xf32, #tpu.memory_space<vmem>>
    %91 = tpu.memref_slice %arg6[%c0_i32_57] : memref<1x!tpu.dma_semaphore, #tpu.memory_space<semaphore_mem>> -> memref<1x!tpu.dma_semaphore, #tpu.memory_space<semaphore_mem>>
    %92 = tpu.memref_squeeze %91 : memref<1x!tpu.dma_semaphore, #tpu.memory_space<semaphore_mem>> -> memref<!tpu.dma_semaphore, #tpu.memory_space<semaphore_mem>>
    tpu.wait_dma2 semaphore(%92 : memref<!tpu.dma_semaphore, #tpu.memory_space<semaphore_mem>>) src(%89 : memref<1x128xf32, #tpu.memory_space<any>>) dst(%90 : memref<1x128xf32, #tpu.memory_space<vmem>>)
    %c0_i32_62 = arith.constant 0 : i32
    %c0_i32_63 = arith.constant 0 : i32
    %c0_i32_64 = arith.constant 0 : i32
    %93 = tpu.memref_slice %arg3[%c0_i32_63, %c0_i32_64] : memref<256x128xf32, #tpu.memory_space<any>> -> memref<1x128xf32, #tpu.memory_space<any>>
    %c3_i32_65 = arith.constant 3 : i32
    %c0_i32_66 = arith.constant 0 : i32
    %94 = tpu.memref_slice %arg5[%c3_i32_65, %c0_i32_66] : memref<8x128xf32, #tpu.memory_space<vmem>> -> memref<1x128xf32, #tpu.memory_space<vmem>>
    %95 = tpu.memref_slice %arg6[%c0_i32_62] : memref<1x!tpu.dma_semaphore, #tpu.memory_space<semaphore_mem>> -> memref<1x!tpu.dma_semaphore, #tpu.memory_space<semaphore_mem>>
    %96 = tpu.memref_squeeze %95 : memref<1x!tpu.dma_semaphore, #tpu.memory_space<semaphore_mem>> -> memref<!tpu.dma_semaphore, #tpu.memory_space<semaphore_mem>>
    tpu.wait_dma2 semaphore(%96 : memref<!tpu.dma_semaphore, #tpu.memory_space<semaphore_mem>>) src(%93 : memref<1x128xf32, #tpu.memory_space<any>>) dst(%94 : memref<1x128xf32, #tpu.memory_space<vmem>>)
    %c0_i32_67 = arith.constant 0 : i32
    %c0_i32_68 = arith.constant 0 : i32
    %c0_i32_69 = arith.constant 0 : i32
    %97 = tpu.memref_slice %arg3[%c0_i32_68, %c0_i32_69] : memref<256x128xf32, #tpu.memory_space<any>> -> memref<1x128xf32, #tpu.memory_space<any>>
    %c4_i32_70 = arith.constant 4 : i32
    %c0_i32_71 = arith.constant 0 : i32
    %98 = tpu.memref_slice %arg5[%c4_i32_70, %c0_i32_71] : memref<8x128xf32, #tpu.memory_space<vmem>> -> memref<1x128xf32, #tpu.memory_space<vmem>>
    %99 = tpu.memref_slice %arg6[%c0_i32_67] : memref<1x!tpu.dma_semaphore, #tpu.memory_space<semaphore_mem>> -> memref<1x!tpu.dma_semaphore, #tpu.memory_space<semaphore_mem>>
    %100 = tpu.memref_squeeze %99 : memref<1x!tpu.dma_semaphore, #tpu.memory_space<semaphore_mem>> -> memref<!tpu.dma_semaphore, #tpu.memory_space<semaphore_mem>>
    tpu.wait_dma2 semaphore(%100 : memref<!tpu.dma_semaphore, #tpu.memory_space<semaphore_mem>>) src(%97 : memref<1x128xf32, #tpu.memory_space<any>>) dst(%98 : memref<1x128xf32, #tpu.memory_space<vmem>>)
    %c0_i32_72 = arith.constant 0 : i32
    %c0_i32_73 = arith.constant 0 : i32
    %c0_i32_74 = arith.constant 0 : i32
    %101 = tpu.memref_slice %arg3[%c0_i32_73, %c0_i32_74] : memref<256x128xf32, #tpu.memory_space<any>> -> memref<1x128xf32, #tpu.memory_space<any>>
    %c5_i32_75 = arith.constant 5 : i32
    %c0_i32_76 = arith.constant 0 : i32
    %102 = tpu.memref_slice %arg5[%c5_i32_75, %c0_i32_76] : memref<8x128xf32, #tpu.memory_space<vmem>> -> memref<1x128xf32, #tpu.memory_space<vmem>>
    %103 = tpu.memref_slice %arg6[%c0_i32_72] : memref<1x!tpu.dma_semaphore, #tpu.memory_space<semaphore_mem>> -> memref<1x!tpu.dma_semaphore, #tpu.memory_space<semaphore_mem>>
    %104 = tpu.memref_squeeze %103 : memref<1x!tpu.dma_semaphore, #tpu.memory_space<semaphore_mem>> -> memref<!tpu.dma_semaphore, #tpu.memory_space<semaphore_mem>>
    tpu.wait_dma2 semaphore(%104 : memref<!tpu.dma_semaphore, #tpu.memory_space<semaphore_mem>>) src(%101 : memref<1x128xf32, #tpu.memory_space<any>>) dst(%102 : memref<1x128xf32, #tpu.memory_space<vmem>>)
    %c0_i32_77 = arith.constant 0 : i32
    %c0_i32_78 = arith.constant 0 : i32
    %c0_i32_79 = arith.constant 0 : i32
    %105 = tpu.memref_slice %arg3[%c0_i32_78, %c0_i32_79] : memref<256x128xf32, #tpu.memory_space<any>> -> memref<1x128xf32, #tpu.memory_space<any>>
    %c6_i32_80 = arith.constant 6 : i32
    %c0_i32_81 = arith.constant 0 : i32
    %106 = tpu.memref_slice %arg5[%c6_i32_80, %c0_i32_81] : memref<8x128xf32, #tpu.memory_space<vmem>> -> memref<1x128xf32, #tpu.memory_space<vmem>>
    %107 = tpu.memref_slice %arg6[%c0_i32_77] : memref<1x!tpu.dma_semaphore, #tpu.memory_space<semaphore_mem>> -> memref<1x!tpu.dma_semaphore, #tpu.memory_space<semaphore_mem>>
    %108 = tpu.memref_squeeze %107 : memref<1x!tpu.dma_semaphore, #tpu.memory_space<semaphore_mem>> -> memref<!tpu.dma_semaphore, #tpu.memory_space<semaphore_mem>>
    tpu.wait_dma2 semaphore(%108 : memref<!tpu.dma_semaphore, #tpu.memory_space<semaphore_mem>>) src(%105 : memref<1x128xf32, #tpu.memory_space<any>>) dst(%106 : memref<1x128xf32, #tpu.memory_space<vmem>>)
    %c0_i32_82 = arith.constant 0 : i32
    %c0_i32_83 = arith.constant 0 : i32
    %c0_i32_84 = arith.constant 0 : i32
    %109 = tpu.memref_slice %arg3[%c0_i32_83, %c0_i32_84] : memref<256x128xf32, #tpu.memory_space<any>> -> memref<1x128xf32, #tpu.memory_space<any>>
    %c7_i32_85 = arith.constant 7 : i32
    %c0_i32_86 = arith.constant 0 : i32
    %110 = tpu.memref_slice %arg5[%c7_i32_85, %c0_i32_86] : memref<8x128xf32, #tpu.memory_space<vmem>> -> memref<1x128xf32, #tpu.memory_space<vmem>>
    %111 = tpu.memref_slice %arg6[%c0_i32_82] : memref<1x!tpu.dma_semaphore, #tpu.memory_space<semaphore_mem>> -> memref<1x!tpu.dma_semaphore, #tpu.memory_space<semaphore_mem>>
    %112 = tpu.memref_squeeze %111 : memref<1x!tpu.dma_semaphore, #tpu.memory_space<semaphore_mem>> -> memref<!tpu.dma_semaphore, #tpu.memory_space<semaphore_mem>>
    tpu.wait_dma2 semaphore(%112 : memref<!tpu.dma_semaphore, #tpu.memory_space<semaphore_mem>>) src(%109 : memref<1x128xf32, #tpu.memory_space<any>>) dst(%110 : memref<1x128xf32, #tpu.memory_space<vmem>>)
    %c0 = arith.constant 0 : index
    %c0_87 = arith.constant 0 : index
    %113 = vector.load %arg5[%c0, %c0_87] : memref<8x128xf32, #tpu.memory_space<vmem>>, vector<8x128xf32>
    %c0_88 = arith.constant 0 : index
    %c0_89 = arith.constant 0 : index
    %c0_90 = arith.constant 0 : index
    %114 = vector.load %arg4[%c0_88, %c0_89, %c0_90] : memref<1x8x128xf32, #tpu.memory_space<vmem>>, vector<1x8x128xf32>
    %115 = vector.shape_cast %114 : vector<1x8x128xf32> to vector<8x128xf32>
    %116 = vector.shape_cast %113 : vector<8x128xf32> to vector<1x8x128xf32>
    tpu.vector_store %arg4[%c0_88, %c0_89, %c0_90], %116 {strides = array<i32>} : memref<1x8x128xf32, #tpu.memory_space<vmem>>, vector<1x8x128xf32>,
    return
  }
  func.func @transform_1(%arg0: i32, %arg1: i32, %arg2: memref<2x8xi32, #tpu.memory_space<smem>>) -> (i32, i32, i32) {
    %c0_i32 = arith.constant 0 : i32
    %c0_i32_0 = arith.constant 0 : i32
    return %arg0, %arg1, %c0_i32 : i32, i32, i32
  }
}

</mosaic_0001>

<bundles_post_ra>
// kernel: tpu_custom_call.1
= control target key start
LH: loop header
LB: loop body
LE: loop exit
PB: predicated region body
PF: predicated region fallthrough
CT: control target
= control target key end

     0   :  { %s781_s12 = smov [#allocation5]   ;;  %s1007_s0 = inlined_call_operand.hbm [shape: s32[2,8], index: 0, kind: input, shape index: {}]   ;;  %s1008_s1 = inlined_call_operand.hbm [shape: f32[256,128], index: 1, kind: input, shape index: {}]   ;;  %s1009_s2 = inlined_call_operand.hbm [shape: f32[2,8,128], index: 2, kind: output, shape index: {}]  }
   0x1   :  { %s8_s11 = sshll.u32 %s1007_s0, 4  ;;  %s9_s11 = int_to_ptr.hbm [resolvable:$true] %s8_s11 }
   0x2   :  { %11 = dma.hbm_to_smem %s9_s11, 32, %s781_s12, [#allocation4] }
   0x3   :  { %757 = dma.done.wait [#allocation4], 32 }
   0x4   :  { %758 = vsyncadd [#allocation4], 4294967264 }
   0x5   :  { %14 = sfence }
   0x6   :  { %15 = vsyncpa [#allocation7], 0 }
   0x7   :  { %17 = vsyncpa [#allocation7 + $0x1], 0  ;;  %s808_s13 = smov 0   ;;  %s810_s14 = smov 0  }
   0x8   :  { %s812_s15 = smov 0   ;;  %s814_s16 = smov 0  }
   0x9 LB: > { %s32_s0 = sadd.s32 1, %s775_s15  ;;  %s388_s17 = sadd.s32 4294967295, %s779_s16   ;;  %s779_s16 = sphi %s814_s16, %s23_s16   ;;  %s775_s15 = sphi %s812_s15, %s1014_s15   ;;  %s771_s14 = sphi %s810_s14, %s1013_s14   ;;  %s767_s13 = sphi %s808_s13, %s1012_s13  }
   0xa   : > { %p34_p0 = scmp.ge.s32.totalorder %s32_s0, 2  ;;  %p50_p1 = scmp.ne.s32.totalorder %s771_s14, %s767_s13 }
   0xb   : > { %s41_s18 = sadd.s32 1, %s771_s14  ;;  %p51_p2 = scmp.eq.s32.totalorder %s388_s17, 1 }
   0xc   : > { %s1016_s0 = smov (%p34_p0, %s32_s0), 0  ;;  %p45_p3 = scmp.eq.s32.totalorder %s779_s16, 1 }
   0xd   : > { %s36_s19 = ssub.s32 %s775_s15, %s1016_s0  ;;  %p838_p6 = por %p51_p2, %p50_p1 }
   0xe   : > { %p39_p4 = scmp.eq.s32.totalorder %s36_s19, 0  ;;  %p389_p5 = scmp.ne.s32.totalorder %s36_s19, 0 }
   0xf   : > { %p390_p8 = scmp.ge.s32.totalorder %s779_s16, 2 }
  0x10   : > { %s843_s21 = scalar_select %p39_p4, %s771_s14, %s41_s18  }
  0x11   : > { %p845_p7 = por %p389_p5, %p45_p3  ;;  %60 = sbr.rel (%p390_p8) target bundleno = 155 (0x9b), region = 12 }
  0x12   : > { %s65_s23 = sand.u32 (!%p390_p8), 1, %s771_s14   ;;  %s852_s24 = sshll.u32 (!%p390_p8), %s775_s15, 7 }
  0x13   : > { %s856_s25 = sshll.u32 (!%p390_p8), %s65_s23, 3  ;;  %s76_s26 = sld [smem:[#allocation5 + %s852_s24]] (!%p390_p8) }
  0x14   : > { %s102_s27 = sadd.s32 (!%p390_p8), 1, %s852_s24  ;;  %s782_s28 = smov (!%p390_p8), [#allocation2]  }
  0x15   : > { %s860_s29 = sshll.u32 (!%p390_p8), %s782_s28, 4  ;;  %s862_s30 = sld [smem:[#allocation5 + %s102_s27]] (!%p390_p8)  ;;  %s92_s29 = int_to_ptr.vmem [resolvable:$true] %s860_s29 }
  0x16   : > { %s130_s3 = sadd.s32 2, %s852_s24  ;;  %s783_s4 = smov [#allocation2 + $0x1]  }
  0x17   : > { %s865_s5 = sshll.u32 %s783_s4, 4  ;;  %s867_s6 = sld [smem:[#allocation5 + %s130_s3]]  ;;  %s120_s5 = int_to_ptr.vmem [resolvable:$true] %s865_s5 }
  0x18   : > { %s882_s27 = scalar_lea.hbm %s1008_s1, 256 }
  0x19   : > { %p77_p9 = scmp.gt.s32.totalorder %s76_s26, 0  ;;  %p393_p10 = scmp.lt.s32.totalorder %s76_s26, 255 }
  0x1b   : > { %s1018_s26 = smov (!%p77_p9, %s76_s26), 0  ;;  %p104_p11 = scmp.gt.s32.totalorder %s862_s30, 0 }
  0x1c   : > { %s1020_s26 = smov (!%p393_p10, %s1018_s26), 255  ;;  %p399_p12 = scmp.lt.s32.totalorder %s862_s30, 255 }
  0x1d   : > { %s105_s7 = scalar_select %p104_p11, %s862_s30, 0 }
  0x1e   : > { %s81_s10 = scalar_lea.hbm %s1008_s1, %s1020_s26  ;;  %p132_p13 = scmp.gt.s32.totalorder %s867_s6, 0 }
  0x1f   : > { %s89_s11 = sshll.u32 %s81_s10, 4  ;;  %p405_p0 = scmp.lt.s32.totalorder %s867_s6, 255  ;;  %s90_s11 = int_to_ptr.hbm [resolvable:$true] %s89_s11 }
  0x20   : > { %s521_s12 = sshra.s32 %s90_s11, 4  ;;  %s522_s12 = int_to_ptr.hbm [resolvable:$true] %s521_s12 }
  0x21   : > { %s523_s17 = scalar_lea.hbm %s522_s12, 1  ;;  %p526_p2 = scmp.lt.s32.totalorder %s522_s12, %s1008_s1 }
  0x22   : > { %p524_p1 = scmp.ne.s32.totalorder %s522_s12, %s523_s17  ;;  %p527_p3 = scmp.lt.s32.totalorder %s882_s27, %s523_s17 }
  0x24   : > { %p528_p4 = por %p527_p3, %p526_p2 }
  0x26   : > { %p529_p5 = pnand %p528_p4, %p524_p1 }
  0x28   : > { %532 = shalt.err (!%p529_p5)  }
  0x29   : > { %94 = dma.hbm_to_vmem [thread:$0]  %s90_s11, 16, %s92_s29, [#allocation3] }
  0x2a   : > { %s1022_s7 = smov (!%p399_p12, %s105_s7), 255  ;;  %s784_s10 = smov [#allocation2 + $0x2]  }
  0x2b   : > { %s133_s26 = scalar_select %p132_p13, %s867_s6, 0 }
  0x2c   : > { %s108_s9 = scalar_lea.hbm %s1008_s1, %s1022_s7  ;;  %s896_s12 = sshll.u32 %s784_s10, 4  ;;  %s148_s12 = int_to_ptr.vmem [resolvable:$true] %s896_s12 }
  0x2d   : > { %s117_s17 = sshll.u32 %s108_s9, 4  ;;  %s158_s18 = sadd.s32 3, %s852_s24  ;;  %s118_s17 = int_to_ptr.hbm [resolvable:$true] %s117_s17 }
  0x2e   : > { %s899_s29 = sld [smem:[#allocation5 + %s158_s18]]  ;;  %s545_s30 = sshra.s32 %s118_s17, 4  ;;  %s546_s30 = int_to_ptr.hbm [resolvable:$true] %s545_s30 }
  0x2f   : > { %s547_s11 = scalar_lea.hbm %s546_s30, 1  ;;  %p550_p9 = scmp.lt.s32.totalorder %s546_s30, %s1008_s1 }
  0x30   : > { %p548_p8 = scmp.ne.s32.totalorder %s546_s30, %s547_s11  ;;  %p551_p10 = scmp.lt.s32.totalorder %s882_s27, %s547_s11 }
  0x32   : > { %p552_p11 = por %p551_p10, %p550_p9 }
  0x34   : > { %p553_p12 = pnand %p552_p11, %p548_p8 }
  0x36   : > { %556 = shalt.err (!%p553_p12)  }
  0x37   : > { %122 = dma.hbm_to_vmem [thread:$0]  %s118_s17, 16, %s120_s5, [#allocation3] }
  0x38   : > { %s1024_s26 = smov (!%p405_p0, %s133_s26), 255  ;;  %s186_s8 = sadd.s32 4, %s852_s24 }
  0x39   : > { %s136_s4 = scalar_lea.hbm %s1008_s1, %s1024_s26  ;;  %s785_s10 = smov [#allocation2 + $0x3]  }
  0x3a   : > { %s145_s9 = sshll.u32 %s136_s4, 4  ;;  %s914_s18 = sshll.u32 %s785_s10, 4  ;;  %s146_s9 = int_to_ptr.hbm [resolvable:$true] %s145_s9  ;;  %s176_s18 = int_to_ptr.vmem [resolvable:$true] %s914_s18 }
  0x3b   : > { %p160_p13 = scmp.gt.s32.totalorder %s899_s29, 0  ;;  %s569_s30 = sshra.s32 %s146_s9, 4  ;;  %s570_s30 = int_to_ptr.hbm [resolvable:$true] %s569_s30 }
  0x3c   : > { %s571_s11 = scalar_lea.hbm %s570_s30, 1  ;;  %p574_p0 = scmp.lt.s32.totalorder %s570_s30, %s1008_s1 }
  0x3d   : > { %p572_p1 = scmp.ne.s32.totalorder %s570_s30, %s571_s11  ;;  %p575_p2 = scmp.lt.s32.totalorder %s882_s27, %s571_s11 }
  0x3f   : > { %p576_p3 = por %p575_p2, %p574_p0 }
  0x41   : > { %p577_p4 = pnand %p576_p3, %p572_p1 }
  0x43   : > { %580 = shalt.err (!%p577_p4)  }
  0x44   : > { %150 = dma.hbm_to_vmem [thread:$0]  %s146_s9, 16, %s148_s12, [#allocation3] }
  0x45   : > { %s161_s6 = scalar_select %p160_p13, %s899_s29, 0 }
  0x46   : > { %p411_p5 = scmp.lt.s32.totalorder %s899_s29, 255  ;;  %s187_s26 = sld [smem:[#allocation5 + %s186_s8]] }
  0x47   : > { %s214_s17 = sadd.s32 5, %s852_s24  ;;  %s786_s28 = smov [#allocation2 + $0x4]  }
  0x48   : > { %s1026_s6 = smov (!%p411_p5, %s161_s6), 255  ;;  %s924_s7 = sshll.u32 %s786_s28, 4  ;;  %s204_s7 = int_to_ptr.vmem [resolvable:$true] %s924_s7 }
  0x49   : > { %s926_s3 = sld [smem:[#allocation5 + %s214_s17]]  ;;  %s164_s12 = scalar_lea.hbm %s1008_s1, %s1026_s6 }
  0x4a   : > { %s173_s9 = sshll.u32 %s164_s12, 4  ;;  %s174_s9 = int_to_ptr.hbm [resolvable:$true] %s173_s9 }
  0x4b   : > { %s593_s29 = sshra.s32 %s174_s9, 4  ;;  %s594_s29 = int_to_ptr.hbm [resolvable:$true] %s593_s29 }
  0x4c   : > { %p188_p8 = scmp.gt.s32.totalorder %s187_s26, 0  ;;  %s595_s8 = scalar_lea.hbm %s594_s29, 1 }
  0x4d   : > { %p596_p9 = scmp.ne.s32.totalorder %s594_s29, %s595_s8  ;;  %p598_p10 = scmp.lt.s32.totalorder %s594_s29, %s1008_s1 }
  0x4e   : > { %p599_p11 = scmp.lt.s32.totalorder %s882_s27, %s595_s8 }
  0x50   : > { %p600_p12 = por %p599_p11, %p598_p10 }
  0x52   : > { %p601_p13 = pnand %p600_p12, %p596_p9 }
  0x54   : > { %604 = shalt.err (!%p601_p13)  }
  0x55   : > { %178 = dma.hbm_to_vmem [thread:$0]  %s174_s9, 16, %s176_s18, [#allocation3] }
  0x56   : > { %s189_s19 = scalar_select %p188_p8, %s187_s26, 0 }
  0x57   : > { %p417_p1 = scmp.lt.s32.totalorder %s187_s26, 255  ;;  %p216_p0 = scmp.gt.s32.totalorder %s926_s3, 0 }
  0x58   : > { %p423_p2 = scmp.lt.s32.totalorder %s926_s3, 255  ;;  %s787_s4 = smov [#allocation2 + $0x5]  }
  0x59   : > { %s1028_s19 = smov (!%p417_p1, %s189_s19), 255  ;;  %s943_s10 = sshll.u32 %s787_s4, 4  ;;  %s232_s10 = int_to_ptr.vmem [resolvable:$true] %s943_s10 }
  0x5a   : > { %s217_s5 = scalar_select %p216_p0, %s926_s3, 0 }
  0x5b   : > { %s192_s28 = scalar_lea.hbm %s1008_s1, %s1028_s19  ;;  %s242_s18 = sadd.s32 6, %s852_s24 }
  0x5c   : > { %s201_s12 = sshll.u32 %s192_s28, 4  ;;  %s946_s9 = sld [smem:[#allocation5 + %s242_s18]]  ;;  %s202_s12 = int_to_ptr.hbm [resolvable:$true] %s201_s12 }
  0x5d   : > { %s617_s29 = sshra.s32 %s202_s12, 4  ;;  %s618_s29 = int_to_ptr.hbm [resolvable:$true] %s617_s29 }
  0x5e   : > { %s619_s26 = scalar_lea.hbm %s618_s29, 1  ;;  %p622_p4 = scmp.lt.s32.totalorder %s618_s29, %s1008_s1 }
  0x5f   : > { %p620_p3 = scmp.ne.s32.totalorder %s618_s29, %s619_s26  ;;  %p623_p5 = scmp.lt.s32.totalorder %s882_s27, %s619_s26 }
  0x61   : > { %p624_p8 = por %p623_p5, %p622_p4 }
  0x63   : > { %p625_p9 = pnand %p624_p8, %p620_p3 }
  0x65   : > { %628 = shalt.err (!%p625_p9)  }
  0x66   : > { %206 = dma.hbm_to_vmem [thread:$0]  %s202_s12, 16, %s204_s7, [#allocation3] }
  0x67   : > { %s1030_s5 = smov (!%p423_p2, %s217_s5), 255  ;;  %s270_s28 = sadd.s32 7, %s852_s24 }
  0x68   : > { %s220_s6 = scalar_lea.hbm %s1008_s1, %s1030_s5  ;;  %p244_p10 = scmp.gt.s32.totalorder %s946_s9, 0 }
  0x69   : > { %s229_s17 = sshll.u32 %s220_s6, 4  ;;  %s230_s17 = int_to_ptr.hbm [resolvable:$true] %s229_s17 }
  0x6a   : > { %s641_s4 = sshra.s32 %s230_s17, 4  ;;  %s642_s4 = int_to_ptr.hbm [resolvable:$true] %s641_s4 }
  0x6b   : > { %s643_s18 = scalar_lea.hbm %s642_s4, 1  ;;  %p646_p12 = scmp.lt.s32.totalorder %s642_s4, %s1008_s1 }
  0x6c   : > { %p644_p11 = scmp.ne.s32.totalorder %s642_s4, %s643_s18  ;;  %p647_p13 = scmp.lt.s32.totalorder %s882_s27, %s643_s18 }
  0x6e   : > { %p648_p1 = por %p647_p13, %p646_p12 }
  0x70   : > { %p649_p0 = pnand %p648_p1, %p644_p11 }
  0x72   : > { %652 = shalt.err (!%p649_p0)  }
  0x73   : > { %234 = dma.hbm_to_vmem [thread:$0]  %s230_s17, 16, %s232_s10, [#allocation3] }
  0x74   : > { %s245_s7 = scalar_select %p244_p10, %s946_s9, 0 }
  0x75   : > { %p429_p2 = scmp.lt.s32.totalorder %s946_s9, 255  ;;  %s271_s24 = sld [smem:[#allocation5 + %s270_s28]] }
  0x76   : > { %s788_s3 = smov [#allocation2 + $0x6]  }
  0x77   : > { %s259_s5 = sshll.u32 %s788_s3, 4  ;;  %s1032_s7 = smov (!%p429_p2, %s245_s7), 255  ;;  %s260_s5 = int_to_ptr.vmem [resolvable:$true] %s259_s5 }
  0x78   : > { %s248_s30 = scalar_lea.hbm %s1008_s1, %s1032_s7 }
  0x79   : > { %s257_s11 = sshll.u32 %s248_s30, 4  ;;  %s258_s11 = int_to_ptr.hbm [resolvable:$true] %s257_s11 }
  0x7a   : > { %s665_s19 = sshra.s32 %s258_s11, 4  ;;  %s666_s19 = int_to_ptr.hbm [resolvable:$true] %s665_s19 }
  0x7b   : > { %p272_p3 = scmp.gt.s32.totalorder %s271_s24, 0  ;;  %s667_s10 = scalar_lea.hbm %s666_s19, 1 }
  0x7c   : > { %p668_p4 = scmp.ne.s32.totalorder %s666_s19, %s667_s10  ;;  %p670_p5 = scmp.lt.s32.totalorder %s666_s19, %s1008_s1 }
  0x7d   : > { %p671_p8 = scmp.lt.s32.totalorder %s882_s27, %s667_s10 }
  0x7f   : > { %p672_p9 = por %p671_p8, %p670_p5 }
  0x81   : > { %p673_p10 = pnand %p672_p9, %p668_p4 }
  0x83   : > { %676 = shalt.err (!%p673_p10)  }
  0x84   : > { %262 = dma.hbm_to_vmem [thread:$0]  %s258_s11, 16, %s260_s5, [#allocation3] }
  0x85   : > { %s273_s9 = scalar_select %p272_p3, %s271_s24, 0 }
  0x86   : > { %p435_p11 = scmp.lt.s32.totalorder %s271_s24, 255  ;;  %s789_s28 = smov [#allocation2 + $0x7]  }
  0x87   : > { %s287_s4 = sshll.u32 %s789_s28, 4  ;;  %s288_s4 = int_to_ptr.vmem [resolvable:$true] %s287_s4 }
  0x88   : > { %s1034_s9 = smov (!%p435_p11, %s273_s9), 255 }
  0x89   : > { %s276_s26 = scalar_lea.hbm %s1008_s1, %s1034_s9 }
  0x8a   : > { %s285_s7 = sshll.u32 %s276_s26, 4  ;;  %s286_s7 = int_to_ptr.hbm [resolvable:$true] %s285_s7 }
  0x8b   : > { %s689_s3 = sshra.s32 %s286_s7, 4  ;;  %s690_s3 = int_to_ptr.hbm [resolvable:$true] %s689_s3 }
  0x8c   : > { %s691_s12 = scalar_lea.hbm %s690_s3, 1  ;;  %p694_p13 = scmp.lt.s32.totalorder %s690_s3, %s1008_s1 }
  0x8d   : > { %p692_p12 = scmp.ne.s32.totalorder %s690_s3, %s691_s12  ;;  %p695_p1 = scmp.lt.s32.totalorder %s882_s27, %s691_s12 }
  0x8f   : > { %p696_p0 = por %p695_p1, %p694_p13 }
  0x91   : > { %p697_p2 = pnand %p696_p0, %p692_p12 }
  0x93   : > { %700 = shalt.err (!%p697_p2)  }
  0x94   : > { %290 = dma.hbm_to_vmem [thread:$0]  %s286_s7, 16, %s288_s4, [#allocation3] }
  0x95   : > { %s67_s24 = scalar_lea.vmem [#allocation6], %s856_s25 }
  0x96   : > { %759 = dma.done.wait [#allocation3], 128 }
  0x97   : > { %760 = vsyncadd [#allocation3], 4294967168  ;;  %s441_s5 = sshll.u32 %s775_s15, 3  ;;  %s324_s6 = sshll.u32 %s67_s24, 4  ;;  %v308_v0 = vld [vmem:[#allocation2] sm:$0xff]  ;;  %s325_s6 = int_to_ptr.vmem [resolvable:$true] %s324_s6 }
  0x98   : > { %s322_s10 = scalar_lea.hbm %s1009_s2, %s441_s5  ;;  %309 = vst [vmem:[%s67_s24] sm:$0xff] %v308_v0  ;;  %s311_s27 = scalar_lea.sflag [#allocation7], %s65_s23 }
  0x99   : > { %s326_s17 = sshll.u32 %s322_s10, 4  ;;  %s327_s17 = int_to_ptr.hbm [resolvable:$true] %s326_s17 }
  0x9a   : > { %461 = dma.vmem_to_hbm [thread:$0]  (%p845_p7), %s325_s6, 128, %s327_s17, %s311_s27  }
  0x9b PF: > { %p467_p3 = scmp.ge.s32.totalorder %s779_s16, 1  ;;  %s338_s15 = sand.u32 1, %s767_s13  }
  0x9c   : > { %s339_s25 = scalar_lea.sflag [#allocation7], %s338_s15 }
  0x9d   : > { %p464_p4 = pnand %p467_p3, %p838_p6 }
  0x9f   : > { %p465_p5 = pneg %p464_p4 }
  0xa1   : > { %762 = dma.done.wait (%p465_p5), %s339_s25, 128  }
  0xa2   : > { %764 = vsyncadd (%p465_p5), %s339_s25, 4294967168  ;;  %s23_s16 = sadd.s32 1, %s779_s16   ;;  %s1012_s13 = smov %s771_s14 }
  0xa3   : > { %p20_p8 = scmp.ge.s32.totalorder %s23_s16, 3   ;;  %s1013_s14 = smov %s843_s21 }
  0xa4   : > { %s1014_s15 = smov %s1016_s0 }
  0xa5   :  { %22 = sbr.rel (!%p20_p8) target bundleno = 9 (0x9), region = 91 }
  0xaa   :  { %345 = vsyncpa [#allocation7], 1 }
  0xab   :  { %347 = vsyncpa [#allocation7 + $0x1], 1 }
  0xac   :  { %348 = vsyncmov [#allocation3] }
  0xaf   :  { %s349_s20 = vpop.sfrf %348 }
  0xb0   :  { %p444_p6 = scmp.ne.s32.totalorder %s349_s20, 0 }
  0xb2   :  { %353 = shalt.err (%p444_p6)  }

</bundles_post_ra>
